<compile_context>
chip_gen: v5e
topology: v5e:2x2
jax: 0.10.0
libtpu: 0.0.40
codegen_flags: <defaults>
</compile_context>

<pallas_src>
import functools

import jax
import jax.numpy as jnp
from jax.experimental import pallas as pl
from jax.experimental.pallas import tpu as pltpu


# ----------------------------------------------------------------------------
# Pallas kernel: fused [upsample] + pad + 3x3 conv + BN affine (+res) (+ReLU)
# ----------------------------------------------------------------------------
def _conv3x3_bn_kernel(x_ref, rhp_ref, band_ref, bias_ref, *rest,
                       H_out, apply_relu, has_residual):
    if has_residual:
        res_ref, o_ref = rest
    else:
        (o_ref,) = rest

    x = x_ref[0].astype(jnp.float32)                      # (H_in, W_in*Cin)

    # Row-direction nearest upsample + 1-row zero pad, fused as one tiny 0/1
    # matmul on the MXU (no HBM round-trip of the upsampled/padded tensor).
    xhp = jnp.dot(rhp_ref[...], x,
                  preferred_element_type=jnp.float32)     # (H_out+2, W_in*Cin)

    # 3x3 conv as three banded-Toeplitz matmuls (one per kernel row kh).
    # W-upsample, W-padding and the folded BN scale all live inside band_ref,
    # so each matmul contracts over K = W_in*Cin (deep) instead of Cin.
    out = jnp.dot(xhp[0:H_out], band_ref[0],
                  preferred_element_type=jnp.float32)     # (H_out, W_out*Cout)
    out = out + jnp.dot(xhp[1:H_out + 1], band_ref[1],
                        preferred_element_type=jnp.float32)
    out = out + jnp.dot(xhp[2:H_out + 2], band_ref[2],
                        preferred_element_type=jnp.float32)

    out = out + bias_ref[...]                             # folded BN bias (+conv bias)
    if has_residual:
        out = out + res_ref[0].astype(jnp.float32)
    if apply_relu:
        out = jnp.maximum(out, 0.0)
    o_ref[0] = out.astype(o_ref.dtype)


# ----------------------------------------------------------------------------
# Trace-time (wrapper side) constant-matrix builders
# ----------------------------------------------------------------------------
def _row_upsample_pad_matrix(h_in, s):
    """(s*h_in + 2, h_in) 0/1 matrix: nearest row-upsample by s, then 1-row zero pad."""
    h_out = s * h_in
    r = jnp.arange(h_out + 2)
    src = (r - 1) // s
    valid = (r >= 1) & (r <= h_out)
    m = valid[:, None] & (src[:, None] == jnp.arange(h_in)[None, :])
    return m.astype(jnp.float32)


def _band_conv_matrices(w_oihw, scale, w_in, s):
    """(3, w_in*Cin, s*w_in*Cout) banded matrices for the 3x3 conv along W.

    Folds: nearest W-upsample by s, 1-column zero padding, and the BN scale.
    Row index = w_in*Cin + ci, column index = w_out*Cout + co.
    """
    cout, cin, kh, kw = w_oihw.shape
    assert kh == 3 and kw == 3
    w_out = s * w_in
    wf = w_oihw.astype(jnp.float32) * scale.astype(jnp.float32)[:, None, None, None]
    wt = jnp.transpose(wf, (2, 3, 1, 0))                   # (kh, kw, Cin, Cout)
    v = jnp.arange(w_out)[:, None] + jnp.arange(3)[None, :] - 1   # (W_out, 3) src col
    src = jnp.where((v >= 0) & (v < w_out), v // s, -1)            # -1 == zero padding
    sel = (src[:, :, None] == jnp.arange(w_in)[None, None, :]).astype(jnp.float32)
    band = jnp.einsum('wkm,hkio->hmiwo', sel, wt)          # (3, w_in, Cin, W_out, Cout)
    return band.reshape(3, w_in * cin, w_out * cout)


# ----------------------------------------------------------------------------
# Fused conv wrapper
# ----------------------------------------------------------------------------
def conv3x3_bn(x2d, cin, w_oihw, scale, bias, *, upsample=1,
               residual=None, apply_relu=False):
    """[nearest-upsample(s)] + 3x3 conv (stride 1, pad 1) + BN affine (+res)(+ReLU).

    x2d:      (N, H_in, W_in*Cin)   NHWC with W and C merged (lane-dense).
    residual: (N, H_out, W_out*Cout) in the same merged layout, or None.
    returns:  (N, H_out, W_out*Cout)
    """
    n, h_in, wc_in = x2d.shape
    w_in = wc_in // cin
    cout = w_oihw.shape[0]
    s = upsample
    h_out, w_out = s * h_in, s * w_in
    wc_out = w_out * cout

    rhp = _row_upsample_pad_matrix(h_in, s)                # (H_out+2, H_in)
    band = _band_conv_matrices(w_oihw, scale, w_in, s)     # (3, W_in*Cin, W_out*Cout)
    bias_row = jnp.tile(bias.astype(jnp.float32), (w_out,)).reshape(1, wc_out)

    has_residual = residual is not None
    kernel = functools.partial(_conv3x3_bn_kernel, H_out=h_out,
                               apply_relu=apply_relu, has_residual=has_residual)

    in_specs = [
        pl.BlockSpec((1, h_in, wc_in), lambda i: (i, 0, 0)),
        pl.BlockSpec((h_out + 2, h_in), lambda i: (0, 0)),
        pl.BlockSpec((3, w_in * cin, wc_out), lambda i: (0, 0, 0)),
        pl.BlockSpec((1, wc_out), lambda i: (0, 0)),
    ]
    args = [x2d, rhp, band, bias_row]
    if has_residual:
        in_specs.append(pl.BlockSpec((1, h_out, wc_out), lambda i: (i, 0, 0)))
        args.append(residual)

    # TODO(synk): for large H*W*C add an H-tile grid axis (halo handled via the
    # row matrix) so v7x's 2 TensorCores / 64 MiB VMEM stay within budget; at
    # these shapes one whole-image block per batch element is optimal.
    return pl.pallas_call(
        kernel,
        out_shape=jax.ShapeDtypeStruct((n, h_out, wc_out), x2d.dtype),
        grid=(n,),
        in_specs=in_specs,
        out_specs=pl.BlockSpec((1, h_out, wc_out), lambda i: (i, 0, 0)),
        compiler_params=pltpu.CompilerParams(
            dimension_semantics=("parallel",),
            vmem_limit_bytes=32 * 1024 * 1024),
    )(*args)


# ----------------------------------------------------------------------------
# Parameter construction (deterministic) and BN folding
# ----------------------------------------------------------------------------
_BN_EPS = 1e-5


def _bn_fold(gamma, beta, mean, var, conv_bias=None, eps=_BN_EPS):
    scale = gamma / jnp.sqrt(var + eps)
    b = conv_bias if conv_bias is not None else jnp.zeros_like(mean)
    bias = (b - mean) * scale + beta
    return scale, bias


def _init_bn(key, c):
    k1, k2, k3, k4 = jax.random.split(key, 4)
    return dict(
        gamma=1.0 + 0.1 * jax.random.normal(k1, (c,), jnp.float32),
        beta=0.1 * jax.random.normal(k2, (c,), jnp.float32),
        mean=0.1 * jax.random.normal(k3, (c,), jnp.float32),
        var=1.0 + 0.1 * jnp.abs(jax.random.normal(k4, (c,), jnp.float32)),
    )


def init_basic_block_dec(key, in_planes, stride):
    planes = in_planes // stride
    keys = jax.random.split(key, 8)
    params = {
        "conv2_w": 0.1 * jax.random.normal(keys[0], (in_planes, in_planes, 3, 3), jnp.float32),
        "bn2": _init_bn(keys[1], in_planes),
        "conv1_w": 0.1 * jax.random.normal(keys[2], (planes, in_planes, 3, 3), jnp.float32),
        "bn1": _init_bn(keys[3], planes),
    }
    if stride != 1:
        params["conv1_b"] = 0.1 * jax.random.normal(keys[4], (planes,), jnp.float32)
        params["sc_conv_w"] = 0.1 * jax.random.normal(keys[5], (planes, in_planes, 3, 3), jnp.float32)
        params["sc_conv_b"] = 0.1 * jax.random.normal(keys[6], (planes,), jnp.float32)
        params["sc_bn"] = _init_bn(keys[7], planes)
    return params


# ----------------------------------------------------------------------------
# Forward pass (matches BasicBlockDec.forward)
# ----------------------------------------------------------------------------
def basic_block_dec_forward(params, x_nchw, stride):
    n, cin, h, w = x_nchw.shape
    planes = cin // stride
    # NCHW -> NHWC -> (N, H, W*C): lane dim carries W*C (dense stores / DMA).
    x2d = jnp.transpose(x_nchw, (0, 2, 3, 1)).reshape(n, h, w * cin)

    # out = relu(bn2(conv2(x)))
    s2, b2 = _bn_fold(**params["bn2"])
    out = conv3x3_bn(x2d, cin, params["conv2_w"], s2, b2, apply_relu=True)

    if stride == 1:
        # out = relu(bn1(conv1(out)) + x)
        s1, b1 = _bn_fold(**params["bn1"])
        out = conv3x3_bn(out, cin, params["conv1_w"], s1, b1,
                         residual=x2d, apply_relu=True)
    else:
        # shortcut = bn_sc(conv_sc(upsample(x)))      (upsample fused in-kernel)
        ssc, bsc = _bn_fold(**params["sc_bn"], conv_bias=params["sc_conv_b"])
        shortcut = conv3x3_bn(x2d, cin, params["sc_conv_w"], ssc, bsc,
                              upsample=stride, apply_relu=False)
        # out = relu(bn1(conv1_resize(out)) + shortcut)
        s1, b1 = _bn_fold(**params["bn1"], conv_bias=params["conv1_b"])
        out = conv3x3_bn(out, cin, params["conv1_w"], s1, b1,
                         upsample=stride, residual=shortcut, apply_relu=True)

    h_out, w_out = stride * h, stride * w
    out = out.reshape(n, h_out, w_out, planes)
    return jnp.transpose(out, (0, 3, 1, 2))  # NHWC -> NCHW


# ----------------------------------------------------------------------------
# Pure-JAX reference for validation
# ----------------------------------------------------------------------------
def _upsample_nearest(x_nhwc, s):
    return jnp.repeat(jnp.repeat(x_nhwc, s, axis=1), s, axis=2)


def _ref_conv3x3(x_nhwc, w_oihw, bias=None):
    wt = jnp.transpose(w_oihw, (2, 3, 1, 0))  # HWIO
    y = jax.lax.conv_general_dilated(
        x_nhwc, wt, window_strides=(1, 1), padding=((1, 1), (1, 1)),
        dimension_numbers=('NHWC', 'HWIO', 'NHWC'))
    if bias is not None:
        y = y + bias
    return y


def _ref_bn(x, bn):
    return (x - bn["mean"]) / jnp.sqrt(bn["var"] + _BN_EPS) * bn["gamma"] + bn["beta"]


def _ref_forward(params, x_nchw, stride):
    x = jnp.transpose(x_nchw, (0, 2, 3, 1))
    out = jax.nn.relu(_ref_bn(_ref_conv3x3(x, params["conv2_w"]), params["bn2"]))
    if stride == 1:
        out = _ref_bn(_ref_conv3x3(out, params["conv1_w"]), params["bn1"]) + x
    else:
        sc = _ref_bn(_ref_conv3x3(_upsample_nearest(x, stride),
                                  params["sc_conv_w"], params["sc_conv_b"]),
                     params["sc_bn"])
        out = _ref_bn(_ref_conv3x3(_upsample_nearest(out, stride),
                                   params["conv1_w"], params["conv1_b"]),
                      params["bn1"]) + sc
    out = jax.nn.relu(out)
    return jnp.transpose(out, (0, 3, 1, 2))


# ----------------------------------------------------------------------------
if __name__ == "__main__":
    key = jax.random.PRNGKey(0)
    kx, kp1, kp2 = jax.random.split(key, 3)

    N, C, H, W = 2, 4, 16, 16
    x = jax.random.normal(kx, (N, C, H, W), jnp.float32)

    # stride = 1 (identity shortcut)
    p1 = init_basic_block_dec(kp1, in_planes=C, stride=1)
    y1 = jax.block_until_ready(basic_block_dec_forward(p1, x, stride=1))
    r1 = _ref_forward(p1, x, stride=1)
    assert y1.shape == (N, C, H, W)
    assert jnp.allclose(y1, r1, atol=1e-4, rtol=1e-4), "stride=1 mismatch"

    # stride = 2 (ResizeConv2d upsampling path + ResizeConv2d+BN shortcut)
    p2 = init_basic_block_dec(kp2, in_planes=C, stride=2)
    y2 = jax.block_until_ready(basic_block_dec_forward(p2, x, stride=2))
    r2 = _ref_forward(p2, x, stride=2)
    assert y2.shape == (N, C // 2, 2 * H, 2 * W)
    assert jnp.allclose(y2, r2, atol=1e-4, rtol=1e-4), "stride=2 mismatch"

    print("KERNEL_OK")
</pallas_src>

<mosaic_0001>
module attributes {stable_mosaic.version = 11 : i64} {
  func.func @_conv3x3_bn_kernel(%arg0: i32, %arg1: memref<1x16x64xf32, #tpu.memory_space<vmem>>, %arg2: memref<18x16xf32, #tpu.memory_space<vmem>>, %arg3: memref<3x64x64xf32, #tpu.memory_space<vmem>>, %arg4: memref<1x64xf32, #tpu.memory_space<vmem>>, %arg5: memref<1x16x64xf32, #tpu.memory_space<vmem>>) attributes {dimension_semantics = [#tpu.dimension_semantics<parallel>], iteration_bounds = array<i64: 2>, scalar_prefetch = 0 : i64, scratch_operands = 0 : i64, tpu.core_type = #tpu.core_type<tc>, window_params = [{transform_indices = @transform_0, window_bounds = array<i64: 1, 16, 64>}, {pipeline_mode = #tpu.pipeline_mode<synchronous>, transform_indices = @transform_1, window_bounds = array<i64: 18, 16>}, {pipeline_mode = #tpu.pipeline_mode<synchronous>, transform_indices = @transform_2, window_bounds = array<i64: 3, 64, 64>}, {pipeline_mode = #tpu.pipeline_mode<synchronous>, transform_indices = @transform_3, window_bounds = array<i64: 1, 64>}, {transform_indices = @transform_4, window_bounds = array<i64: 1, 16, 64>}]} {
    %c0 = arith.constant 0 : index
    %c0_0 = arith.constant 0 : index
    %c0_1 = arith.constant 0 : index
    %0 = vector.load %arg1[%c0, %c0_0, %c0_1] : memref<1x16x64xf32, #tpu.memory_space<vmem>>, vector<1x16x64xf32>
    %1 = vector.shape_cast %0 : vector<1x16x64xf32> to vector<16x64xf32>
    %c0_2 = arith.constant 0 : index
    %c0_3 = arith.constant 0 : index
    %2 = vector.load %arg2[%c0_2, %c0_3] : memref<18x16xf32, #tpu.memory_space<vmem>>, vector<18x16xf32>
    %cst = arith.constant dense<0.000000e+00> : vector<18x64xf32>
    %3 = tpu.matmul %2, %1, %cst {dimension_numbers = #tpu.dot_dimension_numbers<[1], [0], [0], [1], [0, 0, 1, 1], [], []>} : vector<18x16xf32>, vector<16x64xf32>, vector<18x64xf32> -> vector<18x64xf32>
    %4 = vector.extract_strided_slice %3 {offsets = [0, 0], sizes = [16, 64], strides = [1, 1]} : vector<18x64xf32> to vector<16x64xf32>
    %c0_4 = arith.constant 0 : index
    %c0_5 = arith.constant 0 : index
    %c0_6 = arith.constant 0 : index
    %5 = vector.load %arg3[%c0_4, %c0_5, %c0_6] : memref<3x64x64xf32, #tpu.memory_space<vmem>>, vector<1x64x64xf32>
    %6 = vector.shape_cast %5 : vector<1x64x64xf32> to vector<64x64xf32>
    %cst_7 = arith.constant dense<0.000000e+00> : vector<16x64xf32>
    %7 = tpu.matmul %4, %6, %cst_7 {dimension_numbers = #tpu.dot_dimension_numbers<[1], [0], [0], [1], [0, 0, 1, 1], [], []>} : vector<16x64xf32>, vector<64x64xf32>, vector<16x64xf32> -> vector<16x64xf32>
    %8 = vector.extract_strided_slice %3 {offsets = [1, 0], sizes = [16, 64], strides = [1, 1]} : vector<18x64xf32> to vector<16x64xf32>
    %c1 = arith.constant 1 : index
    %c0_8 = arith.constant 0 : index
    %c0_9 = arith.constant 0 : index
    %9 = vector.load %arg3[%c1, %c0_8, %c0_9] : memref<3x64x64xf32, #tpu.memory_space<vmem>>, vector<1x64x64xf32>
    %10 = vector.shape_cast %9 : vector<1x64x64xf32> to vector<64x64xf32>
    %cst_10 = arith.constant dense<0.000000e+00> : vector<16x64xf32>
    %11 = tpu.matmul %8, %10, %cst_10 {dimension_numbers = #tpu.dot_dimension_numbers<[1], [0], [0], [1], [0, 0, 1, 1], [], []>} : vector<16x64xf32>, vector<64x64xf32>, vector<16x64xf32> -> vector<16x64xf32>
    %12 = arith.addf %7, %11 : vector<16x64xf32>
    %13 = vector.extract_strided_slice %3 {offsets = [2, 0], sizes = [16, 64], strides = [1, 1]} : vector<18x64xf32> to vector<16x64xf32>
    %c2 = arith.constant 2 : index
    %c0_11 = arith.constant 0 : index
    %c0_12 = arith.constant 0 : index
    %14 = vector.load %arg3[%c2, %c0_11, %c0_12] : memref<3x64x64xf32, #tpu.memory_space<vmem>>, vector<1x64x64xf32>
    %15 = vector.shape_cast %14 : vector<1x64x64xf32> to vector<64x64xf32>
    %cst_13 = arith.constant dense<0.000000e+00> : vector<16x64xf32>
    %16 = tpu.matmul %13, %15, %cst_13 {dimension_numbers = #tpu.dot_dimension_numbers<[1], [0], [0], [1], [0, 0, 1, 1], [], []>} : vector<16x64xf32>, vector<64x64xf32>, vector<16x64xf32> -> vector<16x64xf32>
    %17 = arith.addf %12, %16 : vector<16x64xf32>
    %c0_14 = arith.constant 0 : index
    %c0_15 = arith.constant 0 : index
    %18 = vector.load %arg4[%c0_14, %c0_15] : memref<1x64xf32, #tpu.memory_space<vmem>>, vector<1x64xf32>
    %19 = vector.broadcast %18 : vector<1x64xf32> to vector<16x64xf32>
    %20 = arith.addf %17, %19 : vector<16x64xf32>
    %cst_16 = arith.constant 0.000000e+00 : f32
    %21 = vector.broadcast %cst_16 : f32 to vector<16x64xf32>
    %22 = arith.maximumf %20, %21 : vector<16x64xf32>
    %c0_17 = arith.constant 0 : index
    %c0_18 = arith.constant 0 : index
    %c0_19 = arith.constant 0 : index
    %23 = vector.load %arg5[%c0_17, %c0_18, %c0_19] : memref<1x16x64xf32, #tpu.memory_space<vmem>>, vector<1x16x64xf32>
    %24 = vector.shape_cast %23 : vector<1x16x64xf32> to vector<16x64xf32>
    %25 = vector.shape_cast %22 : vector<16x64xf32> to vector<1x16x64xf32>
    tpu.vector_store %arg5[%c0_17, %c0_18, %c0_19], %25 {strides = array<i32>} : memref<1x16x64xf32, #tpu.memory_space<vmem>>, vector<1x16x64xf32>,
    return
  }
  func.func @transform_0(%arg0: i32) -> (i32, i32, i32) {
    %c0_i32 = arith.constant 0 : i32
    %c0_i32_0 = arith.constant 0 : i32
    %c0_i32_1 = arith.constant 0 : i32
    return %arg0, %c0_i32, %c0_i32_0 : i32, i32, i32
  }
  func.func @transform_1(%arg0: i32) -> (i32, i32) {
    %c0_i32 = arith.constant 0 : i32
    %c0_i32_0 = arith.constant 0 : i32
    %c0_i32_1 = arith.constant 0 : i32
    return %c0_i32, %c0_i32_0 : i32, i32
  }
  func.func @transform_2(%arg0: i32) -> (i32, i32, i32) {
    %c0_i32 = arith.constant 0 : i32
    %c0_i32_0 = arith.constant 0 : i32
    %c0_i32_1 = arith.constant 0 : i32
    %c0_i32_2 = arith.constant 0 : i32
    return %c0_i32, %c0_i32_0, %c0_i32_1 : i32, i32, i32
  }
  func.func @transform_3(%arg0: i32) -> (i32, i32) {
    %c0_i32 = arith.constant 0 : i32
    %c0_i32_0 = arith.constant 0 : i32
    %c0_i32_1 = arith.constant 0 : i32
    return %c0_i32, %c0_i32_0 : i32, i32
  }
  func.func @transform_4(%arg0: i32) -> (i32, i32, i32) {
    %c0_i32 = arith.constant 0 : i32
    %c0_i32_0 = arith.constant 0 : i32
    %c0_i32_1 = arith.constant 0 : i32
    return %arg0, %c0_i32, %c0_i32_0 : i32, i32, i32
  }
}

</mosaic_0001>

<bundles_post_ra>
// kernel: tpu_custom_call.1
= control target key start
LH: loop header
LB: loop body
LE: loop exit
PB: predicated region body
PF: predicated region fallthrough
CT: control target
= control target key end

     0   :  { %9 = vsyncpa [#allocation3], 0  ;;  %s805_s0 = inlined_call_operand.vmem [shape: f32[2,16,64], index: 0, kind: input, shape index: {}]   ;;  %s806_s1 = inlined_call_operand.vmem [shape: f32[18,16], index: 1, kind: input, shape index: {}]   ;;  %s807_s2 = inlined_call_operand.hbm [shape: f32[3,64,64], index: 2, kind: input, shape index: {}]   ;;  %s808_s3 = inlined_call_operand.vmem [shape: f32[1,64], index: 3, kind: input, shape index: {}]   ;;  %s809_s4 = inlined_call_operand.hbm [shape: f32[2,16,64], index: 4, kind: output, shape index: {}]  }
   0x1   :  { %10 = vsyncpa [#allocation4], 0 }
   0x2   :  { %12 = vsyncpa [#allocation4 + $0x1], 0  ;;  %s687_s15 = smov 0   ;;  %s689_s16 = smov 0  }
   0x3   :  { %s691_s17 = smov 0   ;;  %s693_s18 = smov 0  }
   0x4 LB: > { %s708_s19 = sadd.s32 4294967295, %s655_s18   ;;  %s479_s20 = sadd.s32 4294967294, %s655_s18   ;;  %s655_s18 = sphi %s693_s18, %s815_s18   ;;  %s651_s17 = sphi %s691_s17, %s814_s17   ;;  %s647_s16 = sphi %s689_s16, %s813_s16   ;;  %s643_s15 = sphi %s687_s15, %s812_s15  }
   0x5   : > { %s712_s21 = sadd.s32 1, %s655_s18   ;;  %s114_s22 = sadd.s32 1, %s651_s17 }
   0x6   : > { %s111_s23 = ssub.s32 %s655_s18, %s712_s21  ;;  %p124_p0 = scmp.ne.s32.totalorder %s651_s17, %s647_s16 }
   0x7   : > { %p112_p1 = scmp.eq.s32.totalorder %s111_s23, 0  ;;  %p125_p2 = scmp.eq.s32.totalorder %s708_s19, 1 }
   0x8   : > { %p130_p3 = scmp.ne.s32.totalorder %s647_s16, %s643_s15  ;;  %p131_p4 = scmp.eq.s32.totalorder %s479_s20, 1 }
   0x9   : > { %s723_s24 = scalar_select %p112_p1, %s651_s17, %s114_s22  }
   0xa   : > { %p725_p5 = por %p125_p2, %p124_p0  ;;  %p729_p6 = por %p131_p4, %p130_p3 }
   0xb   : > { %p480_p7 = scmp.ge.s32.totalorder %s655_s18, 1  ;;  %p138_p8 = scmp.lt.s32.totalorder %s655_s18, 3 }
   0xc   : > { %p518_p9 = scmp.eq.s32.totalorder %s708_s19, 0  ;;  %s152_s29 = sshll.u32 %s807_s2, 4  ;;  %s153_s29 = int_to_ptr.hbm [resolvable:$true] %s152_s29 }
   0xd   : > { %p139_p10 = pnand %p480_p7, %p138_p8  ;;  %s657_s30 = smov [#allocation2]  }
   0xe   : > { %s154_s5 = sshll.u32 %s657_s30, 4  ;;  %s658_s6 = smov 128   ;;  %s155_s5 = int_to_ptr.vmem [resolvable:$true] %s154_s5 }
   0xf   : > { %p510_p11 = pneg %p139_p10  ;;  %s659_s7 = smov 8  }
  0x10   : > { %181 = sbr.rel (%p139_p10) target bundleno = 319 (0x13f), region = 36 }
  0x11   : > { %p511_p12 = pnand %p518_p9, %p510_p11 }
  0x13   : > { %513 = dma.hbm_to_vmem [thread:$0]  (!%p511_p12), %s153_s29, 3072, %s155_s5, [#allocation3], %s658_s6, %s658_s6, %s659_s7  }
  0x15   : > { %634 = dma.done.wait (%p518_p9), [#allocation3], 3072  }
  0x16   : > { %636 = vsyncadd (%p518_p9), [#allocation3], 4294964224  ;;  %p208_p13 = scmp.lt.s32.totalorder %s708_s19, 1  ;;  %v215_v2 = vld [vmem:[%s806_s1] sm:$0xff]  ;;  %vm218_vm0 = vcmask 130048   ;;  %v261_v3 = vld [vmem:[#allocation2 + $0x38] sm:$0xff] }
  0x17   : > { %320 = vmatpush.msra.mxu2 %v261_v3  ;;  %v260_v4 = vld [vmem:[#allocation2 + $0x30] sm:$0xff]  ;;  %v259_v5 = vld [vmem:[#allocation2 + $0x28] sm:$0xff]  ;;  %v270_v6 = vld [vmem:[#allocation2 + $0x78] sm:$0xff]  ;;  %vm280_vm1 = vcmask 523264   ;;  %vm274_vm2 = vcmask 1046528   ;;  %vm344_vm3 = vcmask 1045504  }
  0x18   : > { %s209_s8 = scalar_select %p208_p13, %s708_s19, 1  ;;  %v343_v7 = vld [vmem:[#allocation2 + $0xb8] sm:$0xff]  ;;  %v269_v8 = vld [vmem:[#allocation2 + $0x70] sm:$0xff]  ;;  %v258_v9 = vld [vmem:[#allocation2 + $0x20] sm:$0xff]  ;;  %293 = vmatpush.msra.mxu1 %v270_v6 }
  0x19   : > { %321 = vmatpush.msra.mxu2 %v260_v4  ;;  %362 = vmatpush.msra.mxu3 %v343_v7  ;;  %v342_v10 = vld [vmem:[#allocation2 + $0xb0] sm:$0xff]  ;;  %v257_v11 = vld [vmem:[#allocation2 + $0x18] sm:$0xff]  ;;  %v216_v12 = vld [vmem:[%s806_s1 + $0x8] sm:$0xff]  ;;  %s205_s28 = sand.u32 1, %s647_s16   ;;  %s503_s6 = sshll.u32 %s708_s19, 4 }
  0x1a   : > { %s502_s9 = sshll.u32 %s209_s8, 4  ;;  %294 = vmatpush.msra.mxu1 %v269_v8  ;;  %v256_v13 = vld [vmem:[#allocation2 + $0x10] sm:$0xff]  ;;  %v255_v14 = vld [vmem:[#allocation2 + $0x8] sm:$0xff]  ;;  %v254_v16 = vld [vmem:[#allocation2] sm:$0xff]  ;;  %s485_s5 = sshll.u32 %s205_s28, 4 }
  0x1b   : > { %s212_s12 = scalar_lea.vmem %s805_s0, %s502_s9  ;;  %322 = vmatpush.msra.mxu2 %v259_v5  ;;  %363 = vmatpush.msra.mxu3 %v342_v10  ;;  %v217_v15 = vld [vmem:[%s806_s1 + $0x10] sm:$0x3]  ;;  %v268_v17 = vld [vmem:[#allocation2 + $0x68] sm:$0xff]  ;;  %v267_v19 = vld [vmem:[#allocation2 + $0x60] sm:$0xff]  ;;  %s401_s9 = scalar_lea.hbm %s809_s4, %s503_s6 }
  0x1c   : > { %v214_v0 = vld [vmem:[%s212_s12 + $0x8] sm:$0xff]  ;;  %v213_v1 = vld [vmem:[%s212_s12] sm:$0xff]  ;;  %295 = vmatpush.msra.mxu1 %v268_v17  ;;  %v266_v21 = vld [vmem:[#allocation2 + $0x58] sm:$0xff]  ;;  %s207_s10 = scalar_lea.vmem [#allocation5], %s485_s5  ;;  %s404_s12 = sshll.u32 %s401_s9, 4  ;;  %s405_s12 = int_to_ptr.hbm [resolvable:$true] %s404_s12 }
  0x1d   : > { %242 = vmatpush.msra.mxu0 %v214_v0  ;;  %323 = vmatpush.msra.mxu2 %v258_v9  ;;  %v341_v18 = vld [vmem:[#allocation2 + $0xa8] sm:$0xff]  ;;  %v340_v20 = vld [vmem:[#allocation2 + $0xa0] sm:$0xff]  ;;  %v339_v22 = vld [vmem:[#allocation2 + $0x98] sm:$0xff]  ;;  %s402_s11 = sshll.u32 %s207_s10, 4  ;;  %s390_s19 = scalar_lea.sflag [#allocation4], %s205_s28  ;;  %s403_s11 = int_to_ptr.vmem [resolvable:$true] %s402_s11 }
  0x1e   : > { %364 = vmatpush.msra.mxu3 %v341_v18  ;;  %296 = vmatpush.msra.mxu1 %v267_v19  ;;  %v265_v23 = vld [vmem:[#allocation2 + $0x50] sm:$0xff]  ;;  %v264_v25 = vld [vmem:[#allocation2 + $0x48] sm:$0xff]  ;;  %v263_v27 = vld [vmem:[#allocation2 + $0x40] sm:$0xff]  ;;  %s603_s13 = sshra.s32 %s405_s12, 4  ;;  %s609_s23 = scalar_lea.hbm %s809_s4, 32  ;;  %s604_s13 = int_to_ptr.hbm [resolvable:$true] %s603_s13 }
  0x1f   : > { %243 = vmatpush.msra.mxu0 %v213_v1  ;;  %324 = vmatpush.msra.mxu2 %v257_v11  ;;  %v338_v24 = vld [vmem:[#allocation2 + $0x90] sm:$0xff]  ;;  %v337_v26 = vld [vmem:[#allocation2 + $0x88] sm:$0xff]  ;;  %v336_v28 = vld [vmem:[#allocation2 + $0x80] sm:$0xff]  ;;  %s605_s14 = scalar_lea.hbm %s604_s13, 16  ;;  %p610_p3 = scmp.lt.s32.totalorder %s604_s13, %s809_s4 }
  0x20   : > { %488 = vmatmul.msk.f32.vlgmr.msra.gmra.mxu0 %vm218_vm0, %v215_v2  ;;  %365 = vmatpush.msra.mxu3 %v340_v20  ;;  %v558_v45 = vld [vmem:[%s808_s3] ss:$0 sm:$0xff]  ;;  %p606_p0 = scmp.ne.s32.totalorder %s604_s13, %s605_s14  ;;  %p611_p4 = scmp.lt.s32.totalorder %s609_s23, %s605_s14 }
  0x21   : > { %325 = vmatpush.msra.mxu2 %v256_v13  ;;  %297 = vmatpush.msra.mxu1 %v266_v21 }
  0x22   : > { %366 = vmatpush.msra.mxu3 %v339_v22  ;;  %p607_p1 = pnand %p606_p0, %p725_p5  ;;  %p612_p7 = por %p611_p4, %p610_p3 }
  0x23   : > { %326 = vmatpush.msra.mxu2 %v255_v14  ;;  %298 = vmatpush.msra.mxu1 %v265_v23 }
  0x24   : > { %367 = vmatpush.msra.mxu3 %v338_v24  ;;  %p608_p2 = pneg %p607_p1 }
  0x25   : > { %327 = vmatpush.msra.mxu2 %v254_v16  ;;  %299 = vmatpush.msra.mxu1 %v264_v25 }
  0x26   : > { %368 = vmatpush.msra.mxu3 %v337_v26  ;;  %p613_p8 = pnand %p612_p7, %p608_p2 }
  0x27   : > { %300 = vmatpush.msra.mxu1 %v263_v27 }
  0x28   : > { %489 = vmatmul.msk.f32.gmra.mxu0 %vm218_vm0, %v216_v12  ;;  %369 = vmatpush.msra.mxu3 %v336_v28 }
  0x30   : > { %490 = vmatmul.msk.f32.gmra.mxu0 %vm218_vm0, %v217_v15 }
  0x9d   : > { %v245_v29 = vpop.f32.mrf.mxu0 }
  0x9e   : > { %493 = vmatmul.msk.f32.vlgmr.msra.gmra.mxu2 %vm280_vm1, %v245_v29  ;;  %v275_v31 = vrot.slane %v245_v29, 1  ;;  %v345_v32 = vrot.slane %v245_v29, 2 }
  0xa5   : > { %v248_v30 = vpop.f32.mrf.mxu0 }
  0xa6   : > { %v276_v33 = vrot.slane %v248_v30, 1  ;;  %v346_v34 = vrot.slane %v248_v30, 2  ;;  %494 = vmatmul.msk.f32.gmra.mxu2 %vm280_vm1, %v248_v30 }
  0xa8   : > { %v277_v35 = vsel %vm274_vm2, %v275_v31, %v276_v33  ;;  %v347_v36 = vsel %vm344_vm3, %v345_v32, %v346_v34 }
  0xa9   : > { %491 = vmatmul.msk.f32.vlgmr.msra.gmra.mxu1 %vm280_vm1, %v277_v35  ;;  %495 = vmatmul.msk.f32.vlgmr.msra.gmra.mxu3 %vm280_vm1, %v347_v36 }
  0xad   : > { %v251_v37 = vpop.f32.mrf.mxu0 }
  0xae   : > { %v278_v38 = vrot.slane %v251_v37, 1  ;;  %v348_v39 = vrot.slane %v251_v37, 2 }
  0xb0   : > { %v279_v40 = vsel %vm274_vm2, %v276_v33, %v278_v38  ;;  %v349_v41 = vsel %vm344_vm3, %v346_v34, %v348_v39 }
  0xb1   : > { %492 = vmatmul.msk.f32.gmra.mxu1 %vm280_vm1, %v279_v40  ;;  %496 = vmatmul.msk.f32.gmra.mxu3 %vm280_vm1, %v349_v41 }
 0x121   : > { %v329_v43 = vpop.f32.mrf.mxu2 }
 0x126   : > { %v302_v42 = vpop.f32.mrf.mxu1 }
 0x127   : > { %v330_v44 = vadd.f32 %v329_v43, %v302_v42 }
 0x129   : > { %v332_v51 = vpop.f32.mrf.mxu2 }
 0x12c   : > { %v371_v46 = vpop.f32.mrf.mxu3 }
 0x12d   : > { %v377_v47 = vadd.f32 %v371_v46, %v330_v44 }
 0x12e   : > { %v305_v49 = vpop.f32.mrf.mxu1 }
 0x12f   : > { %v383_v48 = vadd.f32 %v558_v45, %v377_v47  ;;  %v333_v52 = vadd.f32 %v332_v51, %v305_v49 }
 0x131   : > { %v385_v50 = vmax.f32 %v383_v48, 0.0 }
 0x133   : > { %387 = vst.msk [vmem:[%s207_s10] sm:$0xff] %vm280_vm1, %v385_v50 }
 0x134   : > { %v374_v53 = vpop.f32.mrf.mxu3 }
 0x135   : > { %v378_v54 = vadd.f32 %v374_v53, %v333_v52 }
 0x137   : > { %v384_v55 = vadd.f32 %v558_v45, %v378_v54 }
 0x139   : > { %v386_v56 = vmax.f32 %v384_v55, 0.0 }
 0x13b   : > { %388 = vst.msk [vmem:[%s207_s10 + $0x8] sm:$0xff] %vm280_vm1, %v386_v56 }
 0x13c   : > { %616 = shalt.err (!%p613_p8)
}
 0x13d   : > { %s660_s28 = smov 128   ;;  %s661_s30 = smov 8  }
 0x13e   : > { %508 = dma.vmem_to_hbm [thread:$0]  (%p725_p5), %s403_s11, 256, %s405_s12, %s390_s19, %s660_s28, %s660_s28, %s661_s30  }
 0x13f PF: > { %p520_p9 = scmp.ge.s32.totalorder %s655_s18, 2  ;;  %s419_s5 = sand.u32 1, %s643_s15  }
 0x140   : > { %s420_s6 = scalar_lea.sflag [#allocation4], %s419_s5 }
 0x141   : > { %p515_p10 = pnand %p520_p9, %p729_p6 }
 0x143   : > { %p516_p11 = pneg %p515_p10 }
 0x145   : > { %638 = dma.done.wait (%p516_p11), %s420_s6, 256  }
 0x146   : > { %640 = vsyncadd (%p516_p11), %s420_s6, 4294967040  ;;  %p15_p12 = scmp.ge.s32.totalorder %s712_s21, 4   ;;  %s812_s15 = smov %s647_s16 }
 0x147   : > { %s813_s16 = smov %s651_s17  ;;  %s814_s17 = smov %s723_s24 }
 0x148   : > { %s815_s18 = smov %s712_s21  ;;  %17 = sbr.rel (!%p15_p12) target bundleno = 4 (0x4), region = 78 }
 0x14d   :  { %426 = vsyncpa [#allocation3], 1 }
 0x14e   :  { %428 = vsyncpa [#allocation3 + $0x1], 1 }
 0x14f   :  { %429 = vsyncpa [#allocation4], 1 }
 0x150   :  { %431 = vsyncpa [#allocation4 + $0x1], 1 }

</bundles_post_ra>
